<compile_context>
chip_gen: v5e
topology: v5e:2x2
jax: 0.10.0
libtpu: 0.0.40
codegen_flags: <defaults>
</compile_context>

<pallas_src>
import numpy as np
import jax
import jax.numpy as jnp
from jax.experimental import pallas as pl
from jax.experimental.pallas import tpu as pltpu

N_QUBITS = 5
DIM = 2 ** N_QUBITS            # 32
NUM_PARAMS = 10                # num_params % n_qubits == 0  ->  q_depth = 2
Q_DEPTH = NUM_PARAMS // N_QUBITS
Q_DELTA = 0.01


def _apply_ginv(idx):
    """Inverse of the CNOT-staircase permutation, as pure int bit-twiddling."""
    for c, t in reversed([(q, q + 1) for q in range(N_QUBITS - 1)]):
        ctrl = (idx >> (N_QUBITS - 1 - c)) & 1
        idx = idx ^ (ctrl << (N_QUBITS - 1 - t))
    return idx


# ---------------------------------------------------------------------------
# Pallas kernel: VPU-only row·column contraction of the circuit
# ---------------------------------------------------------------------------
def encoder_kernel(trig_ref, o_ref):
    """trig_ref: (2*NUM_PARAMS,) f32 in SMEM = [cos(theta/2) | sin(theta/2)].
    o_ref: (1, 1) f32 in VMEM; o_ref[0, 0] = <psi| |0><0| |psi>."""

    def cos(l, q):
        return trig_ref[l * N_QUBITS + q]

    def sin(l, q):
        return trig_ref[NUM_PARAMS + l * N_QUBITS + q]

    col = jax.lax.broadcasted_iota(jnp.int32, (1, DIM), 1)   # basis index b
    ginv = _apply_ginv(col)                                  # staircase folded in

    # ket side: v[b] = (E R_0 |0>)[b] = prod_q RY(theta_{0,q})[ginv(b)_q, 0]
    #   RY = [[c, -s], [s, c]]  ->  column 0 is (c, s)
    v = None
    for q in range(N_QUBITS):
        x = (ginv >> (N_QUBITS - 1 - q)) & 1
        f = jnp.where(x == 0, cos(0, q), sin(0, q))
        v = f if v is None else v * f

    # Middle layers (only traced when Q_DEPTH > 2): v <- v @ (E R_l)^T.
    # Tiles are rebuilt per layer (nothing hoisted across the unroll) to keep
    # vreg pressure flat if the module config ever grows.
    for l in range(1, Q_DEPTH - 1):
        row2 = jax.lax.broadcasted_iota(jnp.int32, (DIM, DIM), 0)
        col2 = jax.lax.broadcasted_iota(jnp.int32, (DIM, DIM), 1)
        g2 = _apply_ginv(col2)
        mt = None
        for q in range(N_QUBITS):
            sh = N_QUBITS - 1 - q
            y = (row2 >> sh) & 1
            x = (g2 >> sh) & 1
            sign = (1 - 2 * y).astype(jnp.float32)
            f = jnp.where(x == y, cos(l, q), sin(l, q) * sign)
            mt = f if mt is None else mt * f
        v = jnp.dot(v, mt, preferred_element_type=jnp.float32)

    if Q_DEPTH >= 2:
        # bra side: <0|E = <0| (|00000> is a fixed point of the staircase), so
        # only row 0 of the last RY layer is needed:
        #   r[b] = R_{L-1}[0, b] = prod_q RY(theta_{L-1,q})[0, b_q], row 0 = (c, -s)
        r = None
        for q in range(N_QUBITS):
            y = (col >> (N_QUBITS - 1 - q)) & 1
            f = jnp.where(y == 0, cos(Q_DEPTH - 1, q), -sin(Q_DEPTH - 1, q))
            r = f if r is None else r * f
        amp = jnp.sum(v * r, axis=-1, keepdims=True)          # (1, 1)
    else:
        amp = jnp.sum(jnp.where(col == 0, v, 0.0), axis=-1, keepdims=True)

    o_ref[...] = amp * amp


@jax.jit
def distribution_encoder_forward(params):
    """params: (NUM_PARAMS,) rotation angles. Returns shape (1,) expectation."""
    half = 0.5 * params.astype(jnp.float32)
    trig = jnp.concatenate([jnp.cos(half), jnp.sin(half)])    # (2*NUM_PARAMS,)
    out = pl.pallas_call(
        encoder_kernel,
        out_shape=jax.ShapeDtypeStruct((1, 1), jnp.float32),
        in_specs=[pl.BlockSpec(memory_space=pltpu.MemorySpace.SMEM)],
        out_specs=pl.BlockSpec(memory_space=pltpu.MemorySpace.VMEM),
        cost_estimate=pl.CostEstimate(
            flops=640, transcendentals=0,
            bytes_accessed=8 * NUM_PARAMS + 4),
    )(trig)
    # matches torch: scalar expectation .unsqueeze(0) -> shape (1,)
    return out.reshape(1)


# ---------------------------------------------------------------------------
# Pure-JAX/numpy reference (validation only; builds full kron unitaries)
# ---------------------------------------------------------------------------
def ry_2x2(theta):
    c = jnp.cos(theta / 2.0)
    s = jnp.sin(theta / 2.0)
    return jnp.stack([jnp.stack([c, -s]), jnp.stack([s, c])])


def build_layer_unitaries(params):
    angles = params.reshape(Q_DEPTH, N_QUBITS)     # qubit 0 = MSB
    layers = []
    for l in range(Q_DEPTH):
        U = ry_2x2(angles[l, 0])
        for q in range(1, N_QUBITS):
            U = jnp.kron(U, ry_2x2(angles[l, q]))
        layers.append(U)
    return jnp.stack(layers).astype(jnp.float32)


def cnot_matrix(n, ctrl, tgt):
    dim = 2 ** n
    M = np.zeros((dim, dim), dtype=np.float32)
    for b in range(dim):
        bits = [(b >> (n - 1 - q)) & 1 for q in range(n)]     # qubit 0 = MSB
        if bits[ctrl] == 1:
            bits[tgt] ^= 1
        nb = 0
        for q in range(n):
            nb = (nb << 1) | bits[q]
        M[nb, b] = 1.0
    return M


def build_entangler():
    E = np.eye(DIM, dtype=np.float32)
    for i in range(N_QUBITS - 1):          # CNOT(0,1), CNOT(1,2), ...
        E = cnot_matrix(N_QUBITS, i, i + 1) @ E
    return jnp.asarray(E)


def reference_forward(params):
    R = build_layer_unitaries(params)
    E = build_entangler()
    state = jnp.zeros((DIM,), jnp.float32).at[0].set(1.0)
    for l in range(Q_DEPTH):
        state = E @ (R[l] @ state)
    return (state[0] ** 2)[None]


if __name__ == "__main__":
    key = jax.random.PRNGKey(0)
    # deterministic parameter init: q_delta * randn(num_params)
    params = (Q_DELTA * jax.random.normal(key, (NUM_PARAMS,))).astype(jnp.float32)

    q_out = distribution_encoder_forward(params)
    q_out = jax.block_until_ready(q_out)

    ref = reference_forward(params)
    np.testing.assert_allclose(np.asarray(q_out), np.asarray(ref),
                               rtol=1e-5, atol=1e-6)
    assert q_out.shape == (1,)
    print("KERNEL_OK")
</pallas_src>

<mosaic_0001>
module attributes {stable_mosaic.version = 11 : i64} {
  func.func @encoder_kernel(%arg0: memref<20xf32, #tpu.memory_space<smem>>, %arg1: memref<1x1xf32, #tpu.memory_space<vmem>>) attributes {dimension_semantics = [], scalar_prefetch = 0 : i64, scratch_operands = 0 : i64, tpu.core_type = #tpu.core_type<tc>} {
    %0 = tpu.iota {dimensions = array<i32: 1>} : vector<1x32xi32>
    %c1_i32 = arith.constant 1 : i32
    %1 = vector.broadcast %c1_i32 : i32 to vector<1x32xi32>
    %2 = arith.shrsi %0, %1 : vector<1x32xi32>
    %c1_i32_0 = arith.constant 1 : i32
    %3 = vector.broadcast %c1_i32_0 : i32 to vector<1x32xi32>
    %4 = arith.andi %2, %3 : vector<1x32xi32>
    %c0_i32 = arith.constant 0 : i32
    %5 = vector.broadcast %c0_i32 : i32 to vector<1x32xi32>
    %6 = arith.shli %4, %5 : vector<1x32xi32>
    %7 = arith.xori %0, %6 : vector<1x32xi32>
    %c2_i32 = arith.constant 2 : i32
    %8 = vector.broadcast %c2_i32 : i32 to vector<1x32xi32>
    %9 = arith.shrsi %7, %8 : vector<1x32xi32>
    %c1_i32_1 = arith.constant 1 : i32
    %10 = vector.broadcast %c1_i32_1 : i32 to vector<1x32xi32>
    %11 = arith.andi %9, %10 : vector<1x32xi32>
    %c1_i32_2 = arith.constant 1 : i32
    %12 = vector.broadcast %c1_i32_2 : i32 to vector<1x32xi32>
    %13 = arith.shli %11, %12 : vector<1x32xi32>
    %14 = arith.xori %7, %13 : vector<1x32xi32>
    %c3_i32 = arith.constant 3 : i32
    %15 = vector.broadcast %c3_i32 : i32 to vector<1x32xi32>
    %16 = arith.shrsi %14, %15 : vector<1x32xi32>
    %c1_i32_3 = arith.constant 1 : i32
    %17 = vector.broadcast %c1_i32_3 : i32 to vector<1x32xi32>
    %18 = arith.andi %16, %17 : vector<1x32xi32>
    %c2_i32_4 = arith.constant 2 : i32
    %19 = vector.broadcast %c2_i32_4 : i32 to vector<1x32xi32>
    %20 = arith.shli %18, %19 : vector<1x32xi32>
    %21 = arith.xori %14, %20 : vector<1x32xi32>
    %c4_i32 = arith.constant 4 : i32
    %22 = vector.broadcast %c4_i32 : i32 to vector<1x32xi32>
    %23 = arith.shrsi %21, %22 : vector<1x32xi32>
    %c1_i32_5 = arith.constant 1 : i32
    %24 = vector.broadcast %c1_i32_5 : i32 to vector<1x32xi32>
    %25 = arith.andi %23, %24 : vector<1x32xi32>
    %c3_i32_6 = arith.constant 3 : i32
    %26 = vector.broadcast %c3_i32_6 : i32 to vector<1x32xi32>
    %27 = arith.shli %25, %26 : vector<1x32xi32>
    %28 = arith.xori %21, %27 : vector<1x32xi32>
    %c4_i32_7 = arith.constant 4 : i32
    %29 = vector.broadcast %c4_i32_7 : i32 to vector<1x32xi32>
    %30 = arith.shrsi %28, %29 : vector<1x32xi32>
    %c1_i32_8 = arith.constant 1 : i32
    %31 = vector.broadcast %c1_i32_8 : i32 to vector<1x32xi32>
    %32 = arith.andi %30, %31 : vector<1x32xi32>
    %c0_i32_9 = arith.constant 0 : i32
    %33 = vector.broadcast %c0_i32_9 : i32 to vector<1x32xi32>
    %34 = arith.cmpi eq, %32, %33 : vector<1x32xi32>
    %c0 = arith.constant 0 : index
    %35 = memref.load %arg0[%c0] : memref<20xf32, #tpu.memory_space<smem>>
    %c10 = arith.constant 10 : index
    %36 = memref.load %arg0[%c10] : memref<20xf32, #tpu.memory_space<smem>>
    %37 = vector.broadcast %35 : f32 to vector<1x32xf32>
    %38 = vector.broadcast %36 : f32 to vector<1x32xf32>
    %39 = arith.select %34, %37, %38 : vector<1x32xi1>, vector<1x32xf32>
    %c3_i32_10 = arith.constant 3 : i32
    %40 = vector.broadcast %c3_i32_10 : i32 to vector<1x32xi32>
    %41 = arith.shrsi %28, %40 : vector<1x32xi32>
    %c1_i32_11 = arith.constant 1 : i32
    %42 = vector.broadcast %c1_i32_11 : i32 to vector<1x32xi32>
    %43 = arith.andi %41, %42 : vector<1x32xi32>
    %c0_i32_12 = arith.constant 0 : i32
    %44 = vector.broadcast %c0_i32_12 : i32 to vector<1x32xi32>
    %45 = arith.cmpi eq, %43, %44 : vector<1x32xi32>
    %c1 = arith.constant 1 : index
    %46 = memref.load %arg0[%c1] : memref<20xf32, #tpu.memory_space<smem>>
    %c11 = arith.constant 11 : index
    %47 = memref.load %arg0[%c11] : memref<20xf32, #tpu.memory_space<smem>>
    %48 = vector.broadcast %46 : f32 to vector<1x32xf32>
    %49 = vector.broadcast %47 : f32 to vector<1x32xf32>
    %50 = arith.select %45, %48, %49 : vector<1x32xi1>, vector<1x32xf32>
    %51 = arith.mulf %39, %50 : vector<1x32xf32>
    %c2_i32_13 = arith.constant 2 : i32
    %52 = vector.broadcast %c2_i32_13 : i32 to vector<1x32xi32>
    %53 = arith.shrsi %28, %52 : vector<1x32xi32>
    %c1_i32_14 = arith.constant 1 : i32
    %54 = vector.broadcast %c1_i32_14 : i32 to vector<1x32xi32>
    %55 = arith.andi %53, %54 : vector<1x32xi32>
    %c0_i32_15 = arith.constant 0 : i32
    %56 = vector.broadcast %c0_i32_15 : i32 to vector<1x32xi32>
    %57 = arith.cmpi eq, %55, %56 : vector<1x32xi32>
    %c2 = arith.constant 2 : index
    %58 = memref.load %arg0[%c2] : memref<20xf32, #tpu.memory_space<smem>>
    %c12 = arith.constant 12 : index
    %59 = memref.load %arg0[%c12] : memref<20xf32, #tpu.memory_space<smem>>
    %60 = vector.broadcast %58 : f32 to vector<1x32xf32>
    %61 = vector.broadcast %59 : f32 to vector<1x32xf32>
    %62 = arith.select %57, %60, %61 : vector<1x32xi1>, vector<1x32xf32>
    %63 = arith.mulf %51, %62 : vector<1x32xf32>
    %c1_i32_16 = arith.constant 1 : i32
    %64 = vector.broadcast %c1_i32_16 : i32 to vector<1x32xi32>
    %65 = arith.shrsi %28, %64 : vector<1x32xi32>
    %c1_i32_17 = arith.constant 1 : i32
    %66 = vector.broadcast %c1_i32_17 : i32 to vector<1x32xi32>
    %67 = arith.andi %65, %66 : vector<1x32xi32>
    %c0_i32_18 = arith.constant 0 : i32
    %68 = vector.broadcast %c0_i32_18 : i32 to vector<1x32xi32>
    %69 = arith.cmpi eq, %67, %68 : vector<1x32xi32>
    %c3 = arith.constant 3 : index
    %70 = memref.load %arg0[%c3] : memref<20xf32, #tpu.memory_space<smem>>
    %c13 = arith.constant 13 : index
    %71 = memref.load %arg0[%c13] : memref<20xf32, #tpu.memory_space<smem>>
    %72 = vector.broadcast %70 : f32 to vector<1x32xf32>
    %73 = vector.broadcast %71 : f32 to vector<1x32xf32>
    %74 = arith.select %69, %72, %73 : vector<1x32xi1>, vector<1x32xf32>
    %75 = arith.mulf %63, %74 : vector<1x32xf32>
    %c0_i32_19 = arith.constant 0 : i32
    %76 = vector.broadcast %c0_i32_19 : i32 to vector<1x32xi32>
    %77 = arith.shrsi %28, %76 : vector<1x32xi32>
    %c1_i32_20 = arith.constant 1 : i32
    %78 = vector.broadcast %c1_i32_20 : i32 to vector<1x32xi32>
    %79 = arith.andi %77, %78 : vector<1x32xi32>
    %c0_i32_21 = arith.constant 0 : i32
    %80 = vector.broadcast %c0_i32_21 : i32 to vector<1x32xi32>
    %81 = arith.cmpi eq, %79, %80 : vector<1x32xi32>
    %c4 = arith.constant 4 : index
    %82 = memref.load %arg0[%c4] : memref<20xf32, #tpu.memory_space<smem>>
    %c14 = arith.constant 14 : index
    %83 = memref.load %arg0[%c14] : memref<20xf32, #tpu.memory_space<smem>>
    %84 = vector.broadcast %82 : f32 to vector<1x32xf32>
    %85 = vector.broadcast %83 : f32 to vector<1x32xf32>
    %86 = arith.select %81, %84, %85 : vector<1x32xi1>, vector<1x32xf32>
    %87 = arith.mulf %75, %86 : vector<1x32xf32>
    %c4_i32_22 = arith.constant 4 : i32
    %88 = vector.broadcast %c4_i32_22 : i32 to vector<1x32xi32>
    %89 = arith.shrsi %0, %88 : vector<1x32xi32>
    %c1_i32_23 = arith.constant 1 : i32
    %90 = vector.broadcast %c1_i32_23 : i32 to vector<1x32xi32>
    %91 = arith.andi %89, %90 : vector<1x32xi32>
    %c0_i32_24 = arith.constant 0 : i32
    %92 = vector.broadcast %c0_i32_24 : i32 to vector<1x32xi32>
    %93 = arith.cmpi eq, %91, %92 : vector<1x32xi32>
    %c5 = arith.constant 5 : index
    %94 = memref.load %arg0[%c5] : memref<20xf32, #tpu.memory_space<smem>>
    %c15 = arith.constant 15 : index
    %95 = memref.load %arg0[%c15] : memref<20xf32, #tpu.memory_space<smem>>
    %cst = arith.constant 0.000000e+00 : f32
    %96 = arith.subf %cst, %95 : f32
    %97 = vector.broadcast %94 : f32 to vector<1x32xf32>
    %98 = vector.broadcast %96 : f32 to vector<1x32xf32>
    %99 = arith.select %93, %97, %98 : vector<1x32xi1>, vector<1x32xf32>
    %c3_i32_25 = arith.constant 3 : i32
    %100 = vector.broadcast %c3_i32_25 : i32 to vector<1x32xi32>
    %101 = arith.shrsi %0, %100 : vector<1x32xi32>
    %c1_i32_26 = arith.constant 1 : i32
    %102 = vector.broadcast %c1_i32_26 : i32 to vector<1x32xi32>
    %103 = arith.andi %101, %102 : vector<1x32xi32>
    %c0_i32_27 = arith.constant 0 : i32
    %104 = vector.broadcast %c0_i32_27 : i32 to vector<1x32xi32>
    %105 = arith.cmpi eq, %103, %104 : vector<1x32xi32>
    %c6 = arith.constant 6 : index
    %106 = memref.load %arg0[%c6] : memref<20xf32, #tpu.memory_space<smem>>
    %c16 = arith.constant 16 : index
    %107 = memref.load %arg0[%c16] : memref<20xf32, #tpu.memory_space<smem>>
    %cst_28 = arith.constant 0.000000e+00 : f32
    %108 = arith.subf %cst_28, %107 : f32
    %109 = vector.broadcast %106 : f32 to vector<1x32xf32>
    %110 = vector.broadcast %108 : f32 to vector<1x32xf32>
    %111 = arith.select %105, %109, %110 : vector<1x32xi1>, vector<1x32xf32>
    %112 = arith.mulf %99, %111 : vector<1x32xf32>
    %c2_i32_29 = arith.constant 2 : i32
    %113 = vector.broadcast %c2_i32_29 : i32 to vector<1x32xi32>
    %114 = arith.shrsi %0, %113 : vector<1x32xi32>
    %c1_i32_30 = arith.constant 1 : i32
    %115 = vector.broadcast %c1_i32_30 : i32 to vector<1x32xi32>
    %116 = arith.andi %114, %115 : vector<1x32xi32>
    %c0_i32_31 = arith.constant 0 : i32
    %117 = vector.broadcast %c0_i32_31 : i32 to vector<1x32xi32>
    %118 = arith.cmpi eq, %116, %117 : vector<1x32xi32>
    %c7 = arith.constant 7 : index
    %119 = memref.load %arg0[%c7] : memref<20xf32, #tpu.memory_space<smem>>
    %c17 = arith.constant 17 : index
    %120 = memref.load %arg0[%c17] : memref<20xf32, #tpu.memory_space<smem>>
    %cst_32 = arith.constant 0.000000e+00 : f32
    %121 = arith.subf %cst_32, %120 : f32
    %122 = vector.broadcast %119 : f32 to vector<1x32xf32>
    %123 = vector.broadcast %121 : f32 to vector<1x32xf32>
    %124 = arith.select %118, %122, %123 : vector<1x32xi1>, vector<1x32xf32>
    %125 = arith.mulf %112, %124 : vector<1x32xf32>
    %c1_i32_33 = arith.constant 1 : i32
    %126 = vector.broadcast %c1_i32_33 : i32 to vector<1x32xi32>
    %127 = arith.shrsi %0, %126 : vector<1x32xi32>
    %c1_i32_34 = arith.constant 1 : i32
    %128 = vector.broadcast %c1_i32_34 : i32 to vector<1x32xi32>
    %129 = arith.andi %127, %128 : vector<1x32xi32>
    %c0_i32_35 = arith.constant 0 : i32
    %130 = vector.broadcast %c0_i32_35 : i32 to vector<1x32xi32>
    %131 = arith.cmpi eq, %129, %130 : vector<1x32xi32>
    %c8 = arith.constant 8 : index
    %132 = memref.load %arg0[%c8] : memref<20xf32, #tpu.memory_space<smem>>
    %c18 = arith.constant 18 : index
    %133 = memref.load %arg0[%c18] : memref<20xf32, #tpu.memory_space<smem>>
    %cst_36 = arith.constant 0.000000e+00 : f32
    %134 = arith.subf %cst_36, %133 : f32
    %135 = vector.broadcast %132 : f32 to vector<1x32xf32>
    %136 = vector.broadcast %134 : f32 to vector<1x32xf32>
    %137 = arith.select %131, %135, %136 : vector<1x32xi1>, vector<1x32xf32>
    %138 = arith.mulf %125, %137 : vector<1x32xf32>
    %c0_i32_37 = arith.constant 0 : i32
    %139 = vector.broadcast %c0_i32_37 : i32 to vector<1x32xi32>
    %140 = arith.shrsi %0, %139 : vector<1x32xi32>
    %c1_i32_38 = arith.constant 1 : i32
    %141 = vector.broadcast %c1_i32_38 : i32 to vector<1x32xi32>
    %142 = arith.andi %140, %141 : vector<1x32xi32>
    %c0_i32_39 = arith.constant 0 : i32
    %143 = vector.broadcast %c0_i32_39 : i32 to vector<1x32xi32>
    %144 = arith.cmpi eq, %142, %143 : vector<1x32xi32>
    %c9 = arith.constant 9 : index
    %145 = memref.load %arg0[%c9] : memref<20xf32, #tpu.memory_space<smem>>
    %c19 = arith.constant 19 : index
    %146 = memref.load %arg0[%c19] : memref<20xf32, #tpu.memory_space<smem>>
    %cst_40 = arith.constant 0.000000e+00 : f32
    %147 = arith.subf %cst_40, %146 : f32
    %148 = vector.broadcast %145 : f32 to vector<1x32xf32>
    %149 = vector.broadcast %147 : f32 to vector<1x32xf32>
    %150 = arith.select %144, %148, %149 : vector<1x32xi1>, vector<1x32xf32>
    %151 = arith.mulf %138, %150 : vector<1x32xf32>
    %152 = arith.mulf %87, %151 : vector<1x32xf32>
    %cst_41 = arith.constant dense<0.000000e+00> : vector<1xf32>
    %153 = vector.multi_reduction <add>, %152, %cst_41 [1] : vector<1x32xf32> to vector<1xf32>
    %154 = vector.shape_cast %153 : vector<1xf32> to vector<1x1xf32>
    %155 = arith.mulf %154, %154 : vector<1x1xf32>
    %c0_42 = arith.constant 0 : index
    %c0_43 = arith.constant 0 : index
    %156 = vector.load %arg1[%c0_42, %c0_43] : memref<1x1xf32, #tpu.memory_space<vmem>>, vector<1x1xf32>
    tpu.vector_store %arg1[%c0_42, %c0_43], %155 {strides = array<i32>} : memref<1x1xf32, #tpu.memory_space<vmem>>, vector<1x1xf32>,
    return
  }
}

</mosaic_0001>

<bundles_post_ra>
// kernel: distribution_encoder_forward.1
= control target key start
LH: loop header
LB: loop body
LE: loop exit
PB: predicated region body
PF: predicated region fallthrough
CT: control target
= control target key end

     0   :  { %6 = vsyncpa [#allocation4], 0  ;;  %s309_s0 = inlined_call_operand.vmem [shape: f32[20], index: 0, kind: input, shape index: {}]   ;;  %s310_s1 = inlined_call_operand.hbm [shape: f32[1,1], index: 1, kind: output, shape index: {}]  }
   0x1   :  { %7 = vsyncpa [#allocation3], 0  ;;  %s13_s8 = sshll.u32 %s309_s0, 4  ;;  %s214_s9 = smov [#allocation2]   ;;  %s14_s8 = int_to_ptr.vmem [resolvable:$true] %s13_s8 }
   0x2   :  { %16 = dma.vmem_to_smem %s14_s8, 16, %s214_s9, [#allocation4]  }
   0x3   :  { %210 = dma.done.wait [#allocation4], 16  }
   0x4   :  { %211 = vsyncadd [#allocation4], 4294967280 }
   0x5   :  { %21 = sfence }
   0x6   :  { %v22_v0 = vlaneseq  ;;  %s236_s10 = sld [smem:[#allocation2]]  ;;  %vm129_vm10 = vcmask 261120   ;;  %s215_s5 = smov [#allocation5]   ;;  %vm134_vm11 = vcmask 0  }
   0x7   :  { %s238_s11 = sld [smem:[#allocation2 + $0xa]]  ;;  %s141_s6 = sshll.u32 %s215_s5, 4  ;;  %s142_s6 = int_to_ptr.vmem [resolvable:$true] %s141_s6 }
   0x8   :  { %v229_v1 = vand.u32 127, %v22_v0  ;;  %s240_s0 = sld [smem:[#allocation2 + $0x1]]  ;;  %s143_s9 = sshll.u32 %s310_s1, 4  ;;  %s144_s9 = int_to_ptr.hbm [resolvable:$true] %s143_s9 }
   0x9   :  { %s242_s12 = sld [smem:[#allocation2 + $0xf]] }
   0xa   :  { %v24_v2 = vshra.s32 %v229_v1, 1  ;;  %s244_s13 = sld [smem:[#allocation2 + $0xb]]  ;;  %v82_v9 = vshra.s32 %v229_v1, 4  ;;  %v91_v10 = vshra.s32 %v229_v1, 3  ;;  %v101_v15 = vshra.s32 %v229_v1, 2 }
   0xb   :  { %s246_s14 = sld [smem:[#allocation2 + $0x10]]  ;;  %v119_v34 = vand.u32 1, %v229_v1 }
   0xc   :  { %v232_v3 = vand.u32 1, %v24_v2  ;;  %s248_s15 = sld [smem:[#allocation2 + $0x2]]  ;;  %v83_v13 = vand.u32 1, %v82_v9  ;;  %v92_v14 = vand.u32 1, %v91_v10  ;;  %v102_v18 = vand.u32 1, %v101_v15 }
   0xd   :  { %s250_s16 = sld [smem:[#allocation2 + $0x5]]  ;;  %v44_v30 = vstv %s236_s10  ;;  %v45_v31 = vstv %s238_s11  ;;  %vm294_vm4 = vcmp.eq.s32.totalorder %v119_v34, 0 }
   0xe   :  { %v26_v4 = vxor.u32 %v232_v3, %v229_v1  ;;  %s254_s17 = sld [smem:[#allocation2 + $0x11]]  ;;  %vm84_vm0 = vcmp.eq.s32.totalorder %v83_v13, 0  ;;  %vm93_vm1 = vcmp.eq.s32.totalorder %v92_v14, 0  ;;  %vm103_vm2 = vcmp.eq.s32.totalorder %v102_v18, 0 }
   0xf   :  { %s164_s18 = sld [smem:[#allocation2 + $0x6]]  ;;  %v52_v32 = vstv %s240_s0  ;;  %vm111_vm3 = vcmp.eq.s32.totalorder %v232_v3, 0 }
  0x10   :  { %v27_v5 = vshra.s32 %v26_v4, 2  ;;  %s256_s19 = sld [smem:[#allocation2 + $0x7]]  ;;  %v53_v36 = vstv %s244_s13 }
  0x11   :  { %s87_s20 = ssub.f32 0.0, %s242_s12 }
  0x12   :  { %v28_v6 = vand.u32 1, %v27_v5  ;;  %s260_s21 = sld [smem:[#allocation2 + $0x12]]  ;;  %v61_v37 = vstv %s248_s15 }
  0x13   :  { %s96_s22 = ssub.f32 0.0, %s246_s14  ;;  %v88_v19 = vstv %s250_s16  ;;  %v89_v20 = vstv %s87_s20 }
  0x14   :  { %v29_v7 = vshll.u32 %v28_v6, 1  ;;  %s263_s23 = sld [smem:[#allocation2 + $0xc]]  ;;  %v90_v25 = vsel %vm84_vm0, %v88_v19, %v89_v20 }
  0x15   :  { %s265_s24 = sld [smem:[#allocation2 + $0x8]]  ;;  %v97_v21 = vstv %s164_s18  ;;  %v98_v22 = vstv %s96_s22 }
  0x16   :  { %v30_v8 = vxor.u32 %v29_v7, %v26_v4  ;;  %s106_s25 = ssub.f32 0.0, %s254_s17  ;;  %v99_v26 = vsel %vm93_vm1, %v97_v21, %v98_v22  ;;  %v107_v27 = vstv %s256_s19 }
  0x17   :  { %s269_s26 = sld [smem:[#allocation2 + $0x13]]  ;;  %v100_v33 = vmul.f32 %v99_v26, %v90_v25 }
  0x18   :  { %v31_v11 = vshra.s32 %v30_v8, 3  ;;  %s271_s27 = sld [smem:[#allocation2 + $0x3]]  ;;  %v108_v28 = vstv %s106_s25 }
  0x19   :  { %s273_s28 = sld [smem:[#allocation2 + $0xd]]  ;;  %v109_v38 = vsel %vm103_vm2, %v107_v27, %v108_v28 }
  0x1a   :  { %v32_v12 = vand.u32 1, %v31_v11  ;;  %s275_s29 = sld [smem:[#allocation2 + $0x9]]  ;;  %v62_v39 = vstv %s263_s23  ;;  %v110_v48 = vmul.f32 %v109_v38, %v100_v33 }
  0x1b   :  { %s114_s30 = ssub.f32 0.0, %s260_s21  ;;  %v115_v40 = vstv %s265_s24 }
  0x1c   :  { %v33_v16 = vshll.u32 %v32_v12, 2  ;;  %s282_s2 = sld [smem:[#allocation2 + $0x4]] }
  0x1d   :  { %s287_s3 = sld [smem:[#allocation2 + $0xe]]  ;;  %v116_v41 = vstv %s114_s30 }
  0x1e   :  { %v34_v17 = vxor.u32 %v33_v16, %v30_v8  ;;  %s123_s4 = ssub.f32 0.0, %s269_s26  ;;  %v70_v46 = vstv %s271_s27  ;;  %v117_v55 = vsel %vm111_vm3, %v115_v40, %v116_v41 }
  0x1f   :  { %v71_v54 = vstv %s273_s28  ;;  %v118_v0 = vmul.f32 %v117_v55, %v110_v48 }
  0x20   :  { %v35_v23 = vshra.s32 %v34_v17, 4  ;;  %v124_v56 = vstv %s275_s29  ;;  %v125_v57 = vstv %s123_s4 }
  0x21   :  { %v126_v2 = vsel %vm294_vm4, %v124_v56, %v125_v57 }
  0x22   :  { %v36_v24 = vand.u32 1, %v35_v23  ;;  %v78_v61 = vstv %s282_s2  ;;  %v127_v6 = vmul.f32 %v126_v2, %v118_v0 }
  0x23   :  { %v79_v63 = vstv %s287_s3 }
  0x24   :  { %v37_v29 = vshll.u32 %v36_v24, 3 }
  0x26   :  { %v38_v35 = vxor.u32 %v37_v29, %v34_v17 }
  0x28   :  { %v39_v42 = vshra.s32 %v38_v35, 4  ;;  %v47_v43 = vshra.s32 %v38_v35, 3  ;;  %v56_v44 = vshra.s32 %v38_v35, 2  ;;  %v65_v45 = vshra.s32 %v38_v35, 1 }
  0x29   :  { %v74_v47 = vand.u32 1, %v38_v35 }
  0x2a   :  { %v40_v50 = vand.u32 1, %v39_v42  ;;  %v48_v51 = vand.u32 1, %v47_v43  ;;  %v57_v52 = vand.u32 1, %v56_v44  ;;  %v66_v53 = vand.u32 1, %v65_v45 }
  0x2b   :  { %vm75_vm9 = vcmp.eq.s32.totalorder %v74_v47, 0 }
  0x2c   :  { %vm41_vm5 = vcmp.eq.s32.totalorder %v40_v50, 0  ;;  %vm49_vm6 = vcmp.eq.s32.totalorder %v48_v51, 0  ;;  %vm58_vm7 = vcmp.eq.s32.totalorder %v57_v52, 0  ;;  %vm67_vm8 = vcmp.eq.s32.totalorder %v66_v53, 0 }
  0x2d   :  { %v46_v58 = vsel %vm41_vm5, %v44_v30, %v45_v31  ;;  %v54_v59 = vsel %vm49_vm6, %v52_v32, %v53_v36  ;;  %v63_v60 = vsel %vm58_vm7, %v61_v37, %v62_v39  ;;  %v72_v1 = vsel %vm67_vm8, %v70_v46, %v71_v54 }
  0x2e   :  { %v55_v62 = vmul.f32 %v54_v59, %v46_v58  ;;  %v80_v4 = vsel %vm75_vm9, %v78_v61, %v79_v63 }
  0x30   :  { %v64_v3 = vmul.f32 %v63_v60, %v55_v62 }
  0x32   :  { %v73_v5 = vmul.f32 %v72_v1, %v64_v3 }
  0x34   :  { %v81_v7 = vmul.f32 %v80_v4, %v73_v5 }
  0x36   :  { %v128_v8 = vmul.f32 %v127_v6, %v81_v7 }
  0x38   :  { %v130_v9 = vsel %vm129_vm10, %v128_v8, 0.0 }
  0x39   :  { %131 = vadd.xlane.f32.xlu0 %v130_v9 }
  0xac   :  { %v132_v10 = vpop.xlane.xlu0 %131 }
  0xad   :  { %v133_v11 = vmul.f32 %v132_v10, %v132_v10 }
  0xaf   :  { %135 = vst.msk [vmem:[#allocation5] sm:$0x1] %vm134_vm11, %v133_v11 }
  0xb0   :  { %146 = dma.vmem_to_hbm [thread:$0]  %s142_s6, 16, %s144_s9, [#allocation3]  }
  0xb1   :  { %212 = dma.done.wait [#allocation3], 16  }
  0xb2   :  { %213 = vsyncadd [#allocation3], 4294967280 }
  0xb3   :  { %151 = vsyncpa [#allocation3], 1 }
  0xb4   :  { %152 = vsyncpa [#allocation4], 1 }

</bundles_post_ra>
